<compile_context>
chip_gen: v7x
topology: tpu7x:2x2x1
jax: 0.10.0
libtpu: 0.0.40
codegen_flags: <defaults>
</compile_context>

<pallas_src>
import math

import numpy as np
import jax
import jax.numpy as jnp
from jax.experimental import pallas as pl
from jax.experimental.pallas import tpu as pltpu


Z_DIM = 540
HEAD_DIMS = [(Z_DIM, 256), (256, 64), (64, 32), (32, 32), (32, 16), (16, 2)]
NUM_CLASSES = 2
OUT_LANES = 128          # lane-dense output width (probs live in lanes 0..1)


def _round_up(n, m):
    return ((n + m - 1) // m) * m


# ---------------------------------------------------------------------------
# Kernel: one fused matmul + closed-form 2-class softmax, lane-dense store.
# ---------------------------------------------------------------------------
def fused_head_kernel(x_ref, w_ref, b_ref, out_ref):
    # [TILE_B, K] @ [K, 2] + [1, 2]  (single MXU pass, f32 accumulate)
    logits = jnp.dot(x_ref[...], w_ref[...], preferred_element_type=jnp.float32)
    logits = logits + b_ref[...]

    # softmax over 2 classes in closed form (EUP exp + approx reciprocal;
    # avoids a cross-lane max/sum on a 2-wide, mostly-masked vector).
    l0 = logits[:, 0:1]
    l1 = logits[:, 1:2]
    d = jnp.clip(l0 - l1, -60.0, 60.0)          # keep exp() finite
    p1 = pl.reciprocal(1.0 + jnp.exp(d), approx=True)
    p1 = jnp.clip(p1, 0.0, 1.0)
    p0 = 1.0 - p1

    # Lane-dense write: place p0 in lane 0, p1 in lane 1, zeros elsewhere.
    tile_b, lanes = out_ref.shape
    lane_ids = jax.lax.broadcasted_iota(jnp.int32, (tile_b, lanes), 1)
    out = jnp.where(lane_ids == 0, p0, jnp.where(lane_ids == 1, p1, 0.0))
    out_ref[...] = out.astype(out_ref.dtype)


# ---------------------------------------------------------------------------
# Parameter construction (per-layer, PyTorch nn.Linear-style) + offline fusion.
# ---------------------------------------------------------------------------
def init_linear(key, fan_in, fan_out):
    """Deterministic PyTorch-nn.Linear-style init; weight stored [in, out]."""
    kw, kb = jax.random.split(key)
    bound = 1.0 / math.sqrt(fan_in)
    w = jax.random.uniform(kw, (fan_in, fan_out), jnp.float32, -bound, bound)
    b = jax.random.uniform(kb, (1, fan_out), jnp.float32, -bound, bound)
    return w, b


def make_params(key, img_channels, height, width):
    flat_dim = img_channels * height * width
    dims = [(flat_dim, Z_DIM)] + HEAD_DIMS      # encoder stand-in + fc1..fc6
    keys = jax.random.split(key, len(dims))
    return [init_linear(k, fi, fo) for k, (fi, fo) in zip(keys, dims)]


def fuse_params(params):
    """Collapse encoder->fc1..fc6 into one (W, b).

    Exact: the reference forward applies no nonlinearity between layers, so
      ((x@We+be)@W1+b1)...@W6+b6 == x@(We@W1..W6) + (be@W1..W6 + b1@W2..W6 + ... + b6).
    Done once at setup (not per forward call).
    """
    w, b = params[0]
    w = w.astype(jnp.float32)
    b = b.astype(jnp.float32)
    for wi, bi in params[1:]:
        w = jnp.dot(w, wi, precision=jax.lax.Precision.HIGHEST)
        b = jnp.dot(b, wi, precision=jax.lax.Precision.HIGHEST) + bi

    # Pad the contraction dim to a multiple of 128 lanes (zero rows are exact).
    k = w.shape[0]
    k_pad = _round_up(k, 128)
    if k_pad != k:
        w = jnp.pad(w, ((0, k_pad - k), (0, 0)))
    return w, b  # [k_pad, 2], [1, 2]


# ---------------------------------------------------------------------------
# Forward wrapper.
# ---------------------------------------------------------------------------
@jax.jit
def encoder_classifier_forward(x, w_fused, b_fused):
    batch = x.shape[0]
    x_flat = x.reshape(batch, -1).astype(jnp.float32)

    # Pad K to match the (lane-padded) fused weight.
    k = x_flat.shape[1]
    k_pad = w_fused.shape[0]
    if k_pad != k:
        x_flat = jnp.pad(x_flat, ((0, 0), (0, k_pad - k)))

    # Batch tiling: one grid step for small batches; 128-row "parallel" tiles
    # for large batches (shards across both TensorCores on v7x).
    if batch <= 128:
        tile_b = _round_up(batch, 8)
    else:
        tile_b = 128
    b_pad = _round_up(batch, tile_b)
    if b_pad != batch:
        x_flat = jnp.pad(x_flat, ((0, b_pad - batch), (0, 0)))

    grid = (b_pad // tile_b,)

    out = pl.pallas_call(
        fused_head_kernel,
        out_shape=jax.ShapeDtypeStruct((b_pad, OUT_LANES), jnp.float32),
        grid=grid,
        in_specs=[
            pl.BlockSpec((tile_b, k_pad), lambda i: (i, 0)),        # x tile
            pl.BlockSpec((k_pad, NUM_CLASSES), lambda i: (0, 0)),   # fused W
            pl.BlockSpec((1, NUM_CLASSES), lambda i: (0, 0)),       # fused b
        ],
        out_specs=pl.BlockSpec((tile_b, OUT_LANES), lambda i: (i, 0)),
        compiler_params=pltpu.CompilerParams(
            dimension_semantics=("parallel",)),
        cost_estimate=pl.CostEstimate(
            flops=2 * b_pad * k_pad * NUM_CLASSES,
            transcendentals=b_pad,
            bytes_accessed=4 * (b_pad * k_pad
                                + k_pad * NUM_CLASSES
                                + NUM_CLASSES
                                + b_pad * OUT_LANES)),
    )(x_flat, w_fused, b_fused)

    return out[:batch, :NUM_CLASSES]


if __name__ == "__main__":
    key = jax.random.PRNGKey(0)
    k_x, k_p = jax.random.split(key)

    # Small shapes consistent with the module: NCHW image batch, imgChannels=3.
    batch, img_channels, height, width = 2, 3, 16, 16
    x = jax.random.normal(k_x, (batch, img_channels, height, width), jnp.float32)

    params = make_params(k_p, img_channels, height, width)
    w_fused, b_fused = fuse_params(params)          # one-time offline fusion
    w_fused = jax.block_until_ready(w_fused)

    out = encoder_classifier_forward(x, w_fused, b_fused)
    out = jax.block_until_ready(out)

    assert out.shape == (batch, NUM_CLASSES)
    # softmax rows must sum to 1
    assert bool(jnp.allclose(jnp.sum(out, axis=-1), 1.0, atol=1e-4))

    # Cross-check against an unfused float64 reference of the same forward pass.
    h = np.asarray(x, dtype=np.float64).reshape(batch, -1)
    for w, b in params:
        h = h @ np.asarray(w, dtype=np.float64) + np.asarray(b, dtype=np.float64)
    h = h - h.max(axis=-1, keepdims=True)
    e = np.exp(h)
    ref = e / e.sum(axis=-1, keepdims=True)
    assert np.allclose(np.asarray(out), ref, atol=5e-3)

    print("KERNEL_OK")
</pallas_src>

<mosaic_0001>
module attributes {stable_mosaic.version = 11 : i64} {
  func.func @fused_head_kernel(%arg0: i32, %arg1: memref<8x768xf32, #tpu.memory_space<vmem>>, %arg2: memref<768x2xf32, #tpu.memory_space<vmem>>, %arg3: memref<1x2xf32, #tpu.memory_space<vmem>>, %arg4: memref<8x128xf32, #tpu.memory_space<vmem>>) attributes {dimension_semantics = [#tpu.dimension_semantics<parallel>], iteration_bounds = array<i64: 1>, scalar_prefetch = 0 : i64, scratch_operands = 0 : i64, tpu.core_type = #tpu.core_type<tc>, window_params = [{transform_indices = @transform_0, window_bounds = array<i64: 8, 768>}, {pipeline_mode = #tpu.pipeline_mode<synchronous>, transform_indices = @transform_1, window_bounds = array<i64: 768, 2>}, {pipeline_mode = #tpu.pipeline_mode<synchronous>, transform_indices = @transform_2, window_bounds = array<i64: 1, 2>}, {transform_indices = @transform_3, window_bounds = array<i64: 8, 128>}]} {
    %c0 = arith.constant 0 : index
    %c0_0 = arith.constant 0 : index
    %0 = vector.load %arg1[%c0, %c0_0] : memref<8x768xf32, #tpu.memory_space<vmem>>, vector<8x768xf32>
    %c0_1 = arith.constant 0 : index
    %c0_2 = arith.constant 0 : index
    %1 = vector.load %arg2[%c0_1, %c0_2] : memref<768x2xf32, #tpu.memory_space<vmem>>, vector<768x2xf32>
    %cst = arith.constant dense<0.000000e+00> : vector<8x2xf32>
    %2 = tpu.matmul %0, %1, %cst {dimension_numbers = #tpu.dot_dimension_numbers<[1], [0], [0], [1], [0, 0, 1, 1], [], []>} : vector<8x768xf32>, vector<768x2xf32>, vector<8x2xf32> -> vector<8x2xf32>
    %c0_3 = arith.constant 0 : index
    %c0_4 = arith.constant 0 : index
    %3 = vector.load %arg3[%c0_3, %c0_4] : memref<1x2xf32, #tpu.memory_space<vmem>>, vector<1x2xf32>
    %4 = vector.broadcast %3 : vector<1x2xf32> to vector<8x2xf32>
    %5 = arith.addf %2, %4 : vector<8x2xf32>
    %6 = vector.extract_strided_slice %5 {offsets = [0, 0], sizes = [8, 1], strides = [1, 1]} : vector<8x2xf32> to vector<8x1xf32>
    %7 = vector.extract_strided_slice %5 {offsets = [0, 1], sizes = [8, 1], strides = [1, 1]} : vector<8x2xf32> to vector<8x1xf32>
    %8 = arith.subf %6, %7 : vector<8x1xf32>
    %cst_5 = arith.constant -6.000000e+01 : f32
    %cst_6 = arith.constant 6.000000e+01 : f32
    %9 = vector.broadcast %cst_5 : f32 to vector<8x1xf32>
    %10 = arith.maximumf %9, %8 : vector<8x1xf32>
    %11 = vector.broadcast %cst_6 : f32 to vector<8x1xf32>
    %12 = arith.minimumf %11, %10 : vector<8x1xf32>
    %13 = math.exp %12 : vector<8x1xf32>
    %cst_7 = arith.constant 1.000000e+00 : f32
    %14 = vector.broadcast %cst_7 : f32 to vector<8x1xf32>
    %15 = arith.addf %14, %13 : vector<8x1xf32>
    %16 = tpu.reciprocal %15 {approx = true} : vector<8x1xf32> -> vector<8x1xf32>
    %cst_8 = arith.constant 0.000000e+00 : f32
    %cst_9 = arith.constant 1.000000e+00 : f32
    %17 = vector.broadcast %cst_8 : f32 to vector<8x1xf32>
    %18 = arith.maximumf %17, %16 : vector<8x1xf32>
    %19 = vector.broadcast %cst_9 : f32 to vector<8x1xf32>
    %20 = arith.minimumf %19, %18 : vector<8x1xf32>
    %cst_10 = arith.constant 1.000000e+00 : f32
    %21 = vector.broadcast %cst_10 : f32 to vector<8x1xf32>
    %22 = arith.subf %21, %20 : vector<8x1xf32>
    %23 = tpu.iota {dimensions = array<i32: 1>} : vector<8x128xi32>
    %c0_i32 = arith.constant 0 : i32
    %24 = vector.broadcast %c0_i32 : i32 to vector<8x128xi32>
    %25 = arith.cmpi eq, %23, %24 : vector<8x128xi32>
    %c1_i32 = arith.constant 1 : i32
    %26 = vector.broadcast %c1_i32 : i32 to vector<8x128xi32>
    %27 = arith.cmpi eq, %23, %26 : vector<8x128xi32>
    %cst_11 = arith.constant 0.000000e+00 : f32
    %28 = vector.shape_cast %20 : vector<8x1xf32> to vector<8x1xf32>
    %29 = vector.broadcast %28 : vector<8x1xf32> to vector<8x128xf32>
    %30 = vector.broadcast %cst_11 : f32 to vector<8x128xf32>
    %31 = arith.select %27, %29, %30 : vector<8x128xi1>, vector<8x128xf32>
    %32 = vector.shape_cast %22 : vector<8x1xf32> to vector<8x1xf32>
    %33 = vector.broadcast %32 : vector<8x1xf32> to vector<8x128xf32>
    %34 = arith.select %25, %33, %31 : vector<8x128xi1>, vector<8x128xf32>
    %c0_12 = arith.constant 0 : index
    %c0_13 = arith.constant 0 : index
    %35 = vector.load %arg4[%c0_12, %c0_13] : memref<8x128xf32, #tpu.memory_space<vmem>>, vector<8x128xf32>
    tpu.vector_store %arg4[%c0_12, %c0_13], %34 {strides = array<i32>} : memref<8x128xf32, #tpu.memory_space<vmem>>, vector<8x128xf32>,
    return
  }
  func.func @transform_0(%arg0: i32) -> (i32, i32) {
    %c0_i32 = arith.constant 0 : i32
    %c0_i32_0 = arith.constant 0 : i32
    return %arg0, %c0_i32 : i32, i32
  }
  func.func @transform_1(%arg0: i32) -> (i32, i32) {
    %c0_i32 = arith.constant 0 : i32
    %c0_i32_0 = arith.constant 0 : i32
    %c0_i32_1 = arith.constant 0 : i32
    return %c0_i32, %c0_i32_0 : i32, i32
  }
  func.func @transform_2(%arg0: i32) -> (i32, i32) {
    %c0_i32 = arith.constant 0 : i32
    %c0_i32_0 = arith.constant 0 : i32
    %c0_i32_1 = arith.constant 0 : i32
    return %c0_i32, %c0_i32_0 : i32, i32
  }
  func.func @transform_3(%arg0: i32) -> (i32, i32) {
    %c0_i32 = arith.constant 0 : i32
    %c0_i32_0 = arith.constant 0 : i32
    return %arg0, %c0_i32 : i32, i32
  }
}

</mosaic_0001>

<bundles_post_ra>
// kernel: encoder_classifier_forward.1
= control target key start
LH: loop header
LB: loop body
LE: loop exit
PB: predicated region body
PF: predicated region fallthrough
CT: control target
= control target key end

     0   :  { %s913_s1 = inlined_call_operand.vmem [shape: f32[768,2], index: 1, kind: input, shape index: {}]   ;;  %s914_s0 = inlined_call_operand.vmem [shape: f32[8,768], index: 0, kind: input, shape index: {}]   ;;  %s915_s2 = inlined_call_operand.vmem [shape: f32[1,2], index: 2, kind: input, shape index: {}]   ;;  %s916_s3 = inlined_call_operand.vmem [shape: f32[8,128], index: 3, kind: output, shape index: {}]  }
   0x1   :  { %v36_v0 = vld [vmem:[%s913_s1 + $0x80] sm:$0xff]  ;;  %v37_v1 = vld [vmem:[%s913_s1 + $0x88] sm:$0xff]  ;;  %v38_v11 = vld [vmem:[%s913_s1 + $0x90] sm:$0xff] }
   0x2   :  { %v20_v2 = vld [vmem:[%s913_s1] sm:$0xff]  ;;  %v475_v3 = vpack.c.bf16 %v37_v1, %v36_v0  ;;  %v21_v4 = vld [vmem:[%s913_s1 + $0x8] sm:$0xff]  ;;  %v39_v13 = vld [vmem:[%s913_s1 + $0x98] sm:$0xff] }
   0x3   :  { %v68_v5 = vld [vmem:[%s913_s1 + $0x180] sm:$0xff]  ;;  %v69_v6 = vld [vmem:[%s913_s1 + $0x188] sm:$0xff]  ;;  %v477_v7 = vpack.c.bf16 %v21_v4, %v20_v2  ;;  %v22_v14 = vld [vmem:[%s913_s1 + $0x10] sm:$0xff]  ;;  %v479_v16 = vpack.c.bf16 %v39_v13, %v38_v11 }
   0x4   :  { %v507_v8 = vpack.c.bf16 %v69_v6, %v68_v5  ;;  %v52_v9 = vld [vmem:[%s913_s1 + $0x100] sm:$0xff]  ;;  %v53_v10 = vld [vmem:[%s913_s1 + $0x108] sm:$0xff]  ;;  %476 = vmatprep.subr.bf16.mxu0 %v475_v3  ;;  %v23_v15 = vld [vmem:[%s913_s1 + $0x18] sm:$0xff] }
   0x5   :  { %v509_v12 = vpack.c.bf16 %v53_v10, %v52_v9  ;;  %478 = vmatpush3.bf16.msra.mxu0 %v477_v7  ;;  %v481_v17 = vpack.c.bf16 %v23_v15, %v22_v14  ;;  %v70_v18 = vld [vmem:[%s913_s1 + $0x190] sm:$0xff]  ;;  %v71_v19 = vld [vmem:[%s913_s1 + $0x198] sm:$0xff]  ;;  %v40_v23 = vld [vmem:[%s913_s1 + $0xa0] sm:$0xff] }
   0x6   :  { %508 = vmatprep.subr.bf16.mxu1 %v507_v8  ;;  %v54_v20 = vld [vmem:[%s913_s1 + $0x110] sm:$0xff]  ;;  %v511_v21 = vpack.c.bf16 %v71_v19, %v70_v18  ;;  %v55_v22 = vld [vmem:[%s913_s1 + $0x118] sm:$0xff]  ;;  %v41_v24 = vld [vmem:[%s913_s1 + $0xa8] sm:$0xff]  ;;  %480 = vmatprep.subr.bf16.mxu0 %v479_v16 }
   0x7   :  { %510 = vmatpush3.bf16.msra.mxu1 %v509_v12  ;;  %v513_v25 = vpack.c.bf16 %v55_v22, %v54_v20  ;;  %v483_v26 = vpack.c.bf16 %v41_v24, %v40_v23  ;;  %v24_v27 = vld [vmem:[%s913_s1 + $0x20] sm:$0xff]  ;;  %v25_v28 = vld [vmem:[%s913_s1 + $0x28] sm:$0xff]  ;;  %v42_v35 = vld [vmem:[%s913_s1 + $0xb0] sm:$0xff] }
   0x8   :  { %v72_v29 = vld [vmem:[%s913_s1 + $0x1a0] sm:$0xff]  ;;  %512 = vmatprep.subr.bf16.mxu1 %v511_v21  ;;  %v73_v30 = vld [vmem:[%s913_s1 + $0x1a8] sm:$0xff]  ;;  %v485_v33 = vpack.c.bf16 %v25_v28, %v24_v27  ;;  %v43_v36 = vld [vmem:[%s913_s1 + $0xb8] sm:$0xff] }
   0x9   :  { %v56_v31 = vld [vmem:[%s913_s1 + $0x120] sm:$0xff]  ;;  %v57_v32 = vld [vmem:[%s913_s1 + $0x128] sm:$0xff]  ;;  %482 = vmatpush3.bf16.msra.mxu0 %v481_v17  ;;  %v515_v34 = vpack.c.bf16 %v73_v30, %v72_v29  ;;  %v26_v37 = vld [vmem:[%s913_s1 + $0x30] sm:$0xff]  ;;  %v487_v39 = vpack.c.bf16 %v43_v36, %v42_v35 }
   0xa   :  { %484 = vmatprep.subr.bf16.mxu0 %v483_v26  ;;  %v517_v38 = vpack.c.bf16 %v57_v32, %v56_v31  ;;  %v27_v40 = vld [vmem:[%s913_s1 + $0x38] sm:$0xff]  ;;  %v74_v41 = vld [vmem:[%s913_s1 + $0x1b0] sm:$0xff]  ;;  %v44_v46 = vld [vmem:[%s913_s1 + $0xc0] sm:$0xff] }
   0xb   :  { %514 = vmatpush3.bf16.msra.mxu1 %v513_v25  ;;  %v75_v42 = vld [vmem:[%s913_s1 + $0x1b8] sm:$0xff]  ;;  %v58_v44 = vld [vmem:[%s913_s1 + $0x130] sm:$0xff]  ;;  %v45_v47 = vld [vmem:[%s913_s1 + $0xc8] sm:$0xff]  ;;  %v489_v48 = vpack.c.bf16 %v27_v40, %v26_v37 }
   0xc   :  { %516 = vmatprep.subr.bf16.mxu1 %v515_v34  ;;  %v519_v43 = vpack.c.bf16 %v75_v42, %v74_v41  ;;  %v59_v45 = vld [vmem:[%s913_s1 + $0x138] sm:$0xff]  ;;  %v76_v49 = vld [vmem:[%s913_s1 + $0x1c0] sm:$0xff]  ;;  %v77_v50 = vld [vmem:[%s913_s1 + $0x1c8] sm:$0xff]  ;;  %v491_v52 = vpack.c.bf16 %v45_v47, %v44_v46 }
   0xd   :  { %486 = vmatpush3.bf16.msra.mxu0 %v485_v33  ;;  %v521_v51 = vpack.c.bf16 %v59_v45, %v58_v44  ;;  %v28_v53 = vld [vmem:[%s913_s1 + $0x40] sm:$0xff]  ;;  %v29_v54 = vld [vmem:[%s913_s1 + $0x48] sm:$0xff]  ;;  %v523_v56 = vpack.c.bf16 %v77_v50, %v76_v49  ;;  %v46_v58 = vld [vmem:[%s913_s1 + $0xd0] sm:$0xff] }
   0xe   :  { %488 = vmatprep.subr.bf16.mxu0 %v487_v39  ;;  %v60_v55 = vld [vmem:[%s913_s1 + $0x140] sm:$0xff]  ;;  %v61_v57 = vld [vmem:[%s913_s1 + $0x148] sm:$0xff]  ;;  %v47_v59 = vld [vmem:[%s913_s1 + $0xd8] sm:$0xff]  ;;  %v493_v62 = vpack.c.bf16 %v29_v54, %v28_v53 }
   0xf   :  { %518 = vmatpush3.bf16.msra.mxu1 %v517_v38  ;;  %v78_v60 = vld [vmem:[%s913_s1 + $0x1d0] sm:$0xff]  ;;  %v79_v61 = vld [vmem:[%s913_s1 + $0x1d8] sm:$0xff]  ;;  %v525_v63 = vpack.c.bf16 %v61_v57, %v60_v55  ;;  %v495_v0 = vpack.c.bf16 %v47_v59, %v46_v58  ;;  %v48_v6 = vld [vmem:[%s913_s1 + $0xe0] sm:$0xff] }
  0x10   :  { %520 = vmatprep.subr.bf16.mxu1 %v519_v43  ;;  %v30_v1 = vld [vmem:[%s913_s1 + $0x50] sm:$0xff]  ;;  %v31_v2 = vld [vmem:[%s913_s1 + $0x58] sm:$0xff]  ;;  %v527_v4 = vpack.c.bf16 %v79_v61, %v78_v60  ;;  %v49_v7 = vld [vmem:[%s913_s1 + $0xe8] sm:$0xff] }
  0x11   :  { %490 = vmatpush3.bf16.msra.mxu0 %v489_v48  ;;  %v62_v3 = vld [vmem:[%s913_s1 + $0x150] sm:$0xff]  ;;  %v63_v5 = vld [vmem:[%s913_s1 + $0x158] sm:$0xff]  ;;  %v80_v8 = vld [vmem:[%s913_s1 + $0x1e0] sm:$0xff]  ;;  %v497_v10 = vpack.c.bf16 %v31_v2, %v30_v1  ;;  %v499_v14 = vpack.c.bf16 %v49_v7, %v48_v6 }
  0x12   :  { %492 = vmatprep.subr.bf16.mxu0 %v491_v52  ;;  %v81_v9 = vld [vmem:[%s913_s1 + $0x1e8] sm:$0xff]  ;;  %v32_v11 = vld [vmem:[%s913_s1 + $0x60] sm:$0xff]  ;;  %v529_v13 = vpack.c.bf16 %v63_v5, %v62_v3  ;;  %v50_v19 = vld [vmem:[%s913_s1 + $0xf0] sm:$0xff] }
  0x13   :  { %522 = vmatpush3.bf16.msra.mxu1 %v521_v51  ;;  %v15_v12 = vld [vmem:[%s914_s0 + $0x8] sm:$0xff]  ;;  %v64_v16 = vld [vmem:[%s913_s1 + $0x160] sm:$0xff]  ;;  %v531_v18 = vpack.c.bf16 %v81_v9, %v80_v8  ;;  %v51_v20 = vld [vmem:[%s913_s1 + $0xf8] sm:$0xff] }
  0x14   :  { %524 = vmatprep.subr.bf16.mxu1 %v523_v56  ;;  %v33_v15 = vld [vmem:[%s913_s1 + $0x68] sm:$0xff]  ;;  %187 = vmatprep.mubr.f32.mxu0 %v15_v12  ;;  %v17_v21 = vld [vmem:[%s914_s0 + $0x18] sm:$0xff]  ;;  %v82_v22 = vld [vmem:[%s913_s1 + $0x1f0] sm:$0xff]  ;;  %v503_v26 = vpack.c.bf16 %v51_v20, %v50_v19 }
  0x15   :  { %494 = vmatpush3.bf16.msra.mxu0 %v493_v62  ;;  %v65_v17 = vld [vmem:[%s913_s1 + $0x168] sm:$0xff]  ;;  %v83_v23 = vld [vmem:[%s913_s1 + $0x1f8] sm:$0xff]  ;;  %257 = vmatprep.mubr.f32.mxu1 %v17_v21  ;;  %v501_v24 = vpack.c.bf16 %v33_v15, %v32_v11  ;;  %v34_v27 = vld [vmem:[%s913_s1 + $0x70] sm:$0xff] }
  0x16   :  { %496 = vmatprep.subr.bf16.mxu0 %v495_v0  ;;  %v533_v25 = vpack.c.bf16 %v65_v17, %v64_v16  ;;  %v35_v28 = vld [vmem:[%s913_s1 + $0x78] sm:$0xff]  ;;  %v66_v29 = vld [vmem:[%s913_s1 + $0x170] sm:$0xff]  ;;  %v535_v30 = vpack.c.bf16 %v83_v23, %v82_v22  ;;  %v100_v32 = vld [vmem:[%s913_s1 + $0x280] sm:$0xff] }
  0x17   :  { %526 = vmatpush3.bf16.msra.mxu1 %v525_v63  ;;  %v67_v31 = vld [vmem:[%s913_s1 + $0x178] sm:$0xff]  ;;  %v101_v33 = vld [vmem:[%s913_s1 + $0x288] sm:$0xff]  ;;  %v505_v34 = vpack.c.bf16 %v35_v28, %v34_v27  ;;  %v84_v37 = vld [vmem:[%s913_s1 + $0x200] sm:$0xff] }
  0x18   :  { %528 = vmatprep.subr.bf16.mxu1 %v527_v4  ;;  %v537_v35 = vpack.c.bf16 %v67_v31, %v66_v29  ;;  %v539_v36 = vpack.c.bf16 %v101_v33, %v100_v32  ;;  %v85_v38 = vld [vmem:[%s913_s1 + $0x208] sm:$0xff]  ;;  %v102_v39 = vld [vmem:[%s913_s1 + $0x290] sm:$0xff]  ;;  %v103_v40 = vld [vmem:[%s913_s1 + $0x298] sm:$0xff] }
  0x19   :  { %498 = vmatpush3.bf16.msra.mxu0 %v497_v10  ;;  %v14_v41 = vld [vmem:[%s914_s0] sm:$0xff]  ;;  %v541_v42 = vpack.c.bf16 %v85_v38, %v84_v37  ;;  %v16_v43 = vld [vmem:[%s914_s0 + $0x10] sm:$0xff]  ;;  %v543_v44 = vpack.c.bf16 %v103_v40, %v102_v39  ;;  %v87_v46 = vld [vmem:[%s913_s1 + $0x218] sm:$0xff] }
  0x1a   :  { %500 = vmatprep.subr.bf16.mxu0 %v499_v14  ;;  %v86_v45 = vld [vmem:[%s913_s1 + $0x210] sm:$0xff]  ;;  %v104_v47 = vld [vmem:[%s913_s1 + $0x2a0] sm:$0xff]  ;;  %v105_v48 = vld [vmem:[%s913_s1 + $0x2a8] sm:$0xff] }
  0x1b   :  { %530 = vmatpush3.bf16.msra.mxu1 %v529_v13  ;;  %v19_v49 = vld [vmem:[%s914_s0 + $0x28] sm:$0xff]  ;;  %v545_v50 = vpack.c.bf16 %v87_v46, %v86_v45  ;;  %v547_v51 = vpack.c.bf16 %v105_v48, %v104_v47  ;;  %v88_v52 = vld [vmem:[%s913_s1 + $0x220] sm:$0xff]  ;;  %v106_v54 = vld [vmem:[%s913_s1 + $0x2b0] sm:$0xff]  ;;  %v347_v46 = vlaneseq }
  0x1c   :  { %532 = vmatprep.subr.bf16.mxu1 %v531_v18  ;;  %v89_v53 = vld [vmem:[%s913_s1 + $0x228] sm:$0xff]  ;;  %v107_v55 = vld [vmem:[%s913_s1 + $0x2b8] sm:$0xff]  ;;  %v90_v58 = vld [vmem:[%s913_s1 + $0x230] sm:$0xff] }
  0x1d   :  { %502 = vmatpush3.bf16.msra.mxu0 %v501_v24  ;;  %v549_v56 = vpack.c.bf16 %v89_v53, %v88_v52  ;;  %v551_v57 = vpack.c.bf16 %v107_v55, %v106_v54  ;;  %v91_v59 = vld [vmem:[%s913_s1 + $0x238] sm:$0xff]  ;;  %v108_v60 = vld [vmem:[%s913_s1 + $0x2c0] sm:$0xff]  ;;  %v109_v61 = vld [vmem:[%s913_s1 + $0x2c8] sm:$0xff]  ;;  %v348_v47 = vand.u32 127, %v347_v46 }
  0x1e   :  { %504 = vmatprep.subr.bf16.mxu0 %v503_v26  ;;  %v553_v62 = vpack.c.bf16 %v91_v59, %v90_v58  ;;  %v555_v63 = vpack.c.bf16 %v109_v61, %v108_v60  ;;  %v92_v0 = vld [vmem:[%s913_s1 + $0x240] sm:$0xff]  ;;  %v93_v1 = vld [vmem:[%s913_s1 + $0x248] sm:$0xff]  ;;  %v110_v2 = vld [vmem:[%s913_s1 + $0x2d0] sm:$0xff] }
  0x1f   :  { %534 = vmatpush3.bf16.msra.mxu1 %v533_v25  ;;  %v111_v3 = vld [vmem:[%s913_s1 + $0x2d8] sm:$0xff]  ;;  %v557_v4 = vpack.c.bf16 %v93_v1, %v92_v0  ;;  %v94_v6 = vld [vmem:[%s913_s1 + $0x250] sm:$0xff]  ;;  %v112_v8 = vld [vmem:[%s913_s1 + $0x2e0] sm:$0xff]  ;;  %vm350_vm0 = vcmp.eq.s32.totalorder %v348_v47, 1  ;;  %vm349_vm1 = vcmp.eq.s32.totalorder %v348_v47, 0 }
  0x20   :  { %536 = vmatprep.subr.bf16.mxu1 %v535_v30  ;;  %v559_v5 = vpack.c.bf16 %v111_v3, %v110_v2  ;;  %v95_v7 = vld [vmem:[%s913_s1 + $0x258] sm:$0xff]  ;;  %v113_v9 = vld [vmem:[%s913_s1 + $0x2e8] sm:$0xff]  ;;  %v96_v12 = vld [vmem:[%s913_s1 + $0x260] sm:$0xff] }
  0x21   :  { %506 = vmatpush3.bf16.msra.mxu0 %v505_v34  ;;  %v561_v10 = vpack.c.bf16 %v95_v7, %v94_v6  ;;  %v563_v11 = vpack.c.bf16 %v113_v9, %v112_v8  ;;  %v97_v13 = vld [vmem:[%s913_s1 + $0x268] sm:$0xff]  ;;  %v114_v14 = vld [vmem:[%s913_s1 + $0x2f0] sm:$0xff]  ;;  %v115_v15 = vld [vmem:[%s913_s1 + $0x2f8] sm:$0xff] }
  0x22   :  { %540 = vmatprep.subr.bf16.mxu0 %v539_v36  ;;  %v565_v16 = vpack.c.bf16 %v97_v13, %v96_v12  ;;  %v567_v17 = vpack.c.bf16 %v115_v15, %v114_v14  ;;  %v98_v18 = vld [vmem:[%s913_s1 + $0x270] sm:$0xff]  ;;  %v99_v19 = vld [vmem:[%s913_s1 + $0x278] sm:$0xff]  ;;  %v18_v21 = vld [vmem:[%s914_s0 + $0x20] sm:$0xff]  ;;  %s579_s1 = smov 127  }
  0x23   :  { %538 = vmatpush3.bf16.msra.mxu1 %v537_v35  ;;  %v569_v20 = vpack.c.bf16 %v99_v19, %v98_v18  ;;  %v368_v23 = vld [vmem:[%s915_s2] ss:$0 sm:$0xff]  ;;  %v580_v35 = vmov 0  }
  0x24   :  { %188 = vmatmul.mubr.f32.vlgmr.msra.gmra.mrb[0].mxu0 %v14_v41  ;;  %573 = vset.pattern.permute.xlu0 %v580_v35 }
  0x25   :  { %542 = vmatpush3.bf16.msra.mxu0 %v541_v42  ;;  %327 = vmatprep.mubr.f32.mxu0 %v19_v49 }
  0x26   :  { %258 = vmatmul.mubr.f32.vlgmr.msra.gmra.mrb[0].mxu1 %v16_v43  ;;  %544 = vmatprep.subr.bf16.mxu0 %v543_v44 }
  0x27   :  { %574 = vset.pattern.permute.xlu1 %v580_v35 }
  0x29   :  { %546 = vmatpush3.bf16.msra.mxu0 %v545_v50 }
  0x2a   :  { %548 = vmatprep.subr.bf16.mxu0 %v547_v51 }
  0x2d   :  { %550 = vmatpush3.bf16.msra.mxu0 %v549_v56 }
  0x2e   :  { %552 = vmatprep.subr.bf16.mxu0 %v551_v57 }
  0x31   :  { %554 = vmatpush3.bf16.msra.mxu0 %v553_v62 }
  0x32   :  { %556 = vmatprep.subr.bf16.mxu0 %v555_v63 }
  0x35   :  { %558 = vmatpush3.bf16.msra.mxu0 %v557_v4 }
  0x36   :  { %560 = vmatprep.subr.bf16.mxu0 %v559_v5 }
  0x39   :  { %562 = vmatpush3.bf16.msra.mxu0 %v561_v10 }
  0x3a   :  { %564 = vmatprep.subr.bf16.mxu0 %v563_v11 }
  0x3d   :  { %566 = vmatpush3.bf16.msra.mxu0 %v565_v16 }
  0x3e   :  { %568 = vmatprep.subr.bf16.mxu0 %v567_v17 }
  0x41   :  { %570 = vmatpush3.bf16.msra.mxu0 %v569_v20 }
  0x44   :  { %328 = vmatmul.mubr.f32.vlgmr.msra.gmra.mrb[2].mxu0 %v18_v21 }
  0xf7   :  { %v402_v22 = vpop.f32.mrb[0].mxu0 }
  0xf8   :  { %v403_v24 = vpop.f32.mrb[1].mxu0 }
  0xf9   :  { %v437_v25 = vpop.f32.mrb[0].mxu1  ;;  %v404_v26 = vadd.f32 %v403_v24, %v402_v22 }
  0xfa   :  { %v438_v27 = vpop.f32.mrb[1].mxu1 }
  0xfb   :  { %v439_v28 = vadd.f32 %v438_v27, %v437_v25  ;;  %v190_v29 = vadd.f32 %v404_v26, %v368_v23 }
  0xfd   :  { %v260_v30 = vadd.f32 %v439_v28, %v190_v29 }
 0x117   :  { %v472_v31 = vpop.f32.mrb[2].mxu0 }
 0x118   :  { %v473_v32 = vpop.f32.mrb[3].mxu0 }
 0x119   :  { %v474_v33 = vadd.f32 %v473_v32, %v472_v31 }
 0x11b   :  { %v330_v34 = vadd.f32 %v474_v33, %v260_v30 }
 0x11d   :  { %334 = vrot.lane.b32.xlu0 %v330_v34, %s579_s1 }
 0x18f   :  { %v335_v36 = vpop.permute.xlu0 %334 }
 0x190   :  { %v337_v37 = vsub.f32 %v330_v34, %v335_v36 }
 0x192   :  { %v369_v38 = vclamps-f32 %v337_v37, 60.0 }
 0x194   :  { %v340_v39 = vmul.f32 1.442695, %v369_v38 }
 0x196   :  { %575 = vpow2.f32 %v340_v39 }
 0x1a0   :  { %v576_v40 = vpop.eup %575 }
 0x1a1   :  { %v342_v41 = vadd.f32 1.0, %v576_v40 }
 0x1a3   :  { %577 = vrcp.f32 %v342_v41 }
 0x1ad   :  { %v578_v42 = vpop.eup %577 }
 0x1ae   :  { %v344_v43 = vmax.f32 %v578_v42, 0.0 }
 0x1b0   :  { %v345_v44 = vmin.f32 %v344_v43, 1.0 }
 0x1b2   :  { %353 = vperm.xlu0 %573, %v345_v44   ;;  %v346_v45 = vsub.f32 1.0, %v345_v44 }
 0x1b4   :  { %359 = vperm.xlu1 %574, %v346_v45  }
 0x231   :  { %v354_v48 = vpop.permute.xlu0 %353 }
 0x232   :  { %v356_v49 = vsel %vm350_vm0, %v354_v48, 0.0 }
 0x233   :  { %v360_v50 = vpop.permute.xlu1 %359 }
 0x234   :  { %v362_v51 = vsel %vm349_vm1, %v360_v50, %v356_v49 }
 0x235   :  { %363 = vst [vmem:[%s916_s3] sm:$0xff] %v362_v51 }

</bundles_post_ra>
